<compile_context>
chip_gen: v6e
topology: v6e:2x2x1
jax: 0.10.0
libtpu: 0.0.40
codegen_flags: <defaults>
</compile_context>

<pallas_src>
import math
from functools import partial

import jax
import jax.numpy as jnp
from jax.experimental import pallas as pl
from jax.experimental.pallas import tpu as pltpu


def _mha_kernel(num_heads, head_dim, need_weights,
                x_ref, maskadd_ref,
                wqkv_ref, bqkv_ref,
                wo_ref, bo_ref,
                *out_refs):
    H, Dh = num_heads, head_dim

    x = x_ref[0].astype(jnp.float32)              # (S, E)
    mask_add = maskadd_ref[...].astype(jnp.float32)  # (1, 1, S) additive mask (0 or -1e30)

    # Fused, head-batched QKV projection: one batched MXU pass instead of 3 separate ones.
    # wqkv_ref: (H, E, 3*Dh) with the 1/sqrt(Dh) scale already folded into the Q columns.
    xb = jnp.broadcast_to(x, (H,) + x.shape)                                  # (H, S, E)
    qkv = jnp.einsum('hse,hef->hsf', xb, wqkv_ref[...],
                     preferred_element_type=jnp.float32) + bqkv_ref[...]      # (H, S, 3Dh)

    q = qkv[:, :, :Dh]                # (H, S, Dh)  (already scaled)
    k = qkv[:, :, Dh:2 * Dh]          # (H, S, Dh)
    v = qkv[:, :, 2 * Dh:]            # (H, S, Dh)

    # Head-batched attention scores + key padding mask (broadcast over heads & query rows).
    scores = jnp.einsum('hqd,hkd->hqk', q, k,
                        preferred_element_type=jnp.float32)                   # (H, S, S)
    scores = scores + mask_add

    # Softmax over keys (f32 throughout).
    m = jnp.max(scores, axis=-1, keepdims=True)
    e = jnp.exp(scores - m)
    denom = jnp.sum(e, axis=-1, keepdims=True)
    p = e * pl.reciprocal(denom, approx=True)                                 # (H, S, S)

    # Head-batched context and output projection; sum over heads replaces the old
    # lane-axis concatenate + single big matmul.
    ctx = jnp.einsum('hqk,hkd->hqd', p, v,
                     preferred_element_type=jnp.float32)                      # (H, S, Dh)
    out_h = jnp.einsum('hqd,hde->hqe', ctx, wo_ref[...],
                       preferred_element_type=jnp.float32)                    # (H, S, E)
    out = jnp.sum(out_h, axis=0) + bo_ref[...]                                # (S, E)

    out_refs[0][0] = out.astype(out_refs[0].dtype)
    if need_weights:
        # nn.MultiheadAttention default: attention weights averaged over heads.
        out_refs[1][0] = (jnp.sum(p, axis=0) * (1.0 / H)).astype(out_refs[1].dtype)


def transpose_multihead_attention(x, params, mask=None, *, num_heads=1, need_weights=True):
    """
    x:    (B, S, E) float32
    mask: (B, S) bool, True = valid (same convention as the PyTorch module).
    Returns attn_output (B, S, E) and, if need_weights, attn_weights (B, S, S).
    """
    B, S, E = x.shape
    assert E % num_heads == 0
    H = num_heads
    Dh = E // H
    scale = 1.0 / math.sqrt(Dh)

    if mask is None:
        mask = jnp.ones((B, S), dtype=bool)
    # Module semantics: mask[:, 0] = True; key_padding_mask = ~mask (True = invalid key).
    mask = mask.at[:, 0].set(True)
    key_padding = jnp.logical_not(mask)
    mask_add = jnp.where(key_padding, jnp.float32(-1e30), jnp.float32(0.0)).reshape(B, 1, S)

    # --- Host-side weight packing (free; all layout plumbing lives here) ---------------
    in_w, in_b = params["in_proj_weight"], params["in_proj_bias"]       # (3E, E), (3E,)
    wq = jnp.swapaxes(in_w[:E].reshape(H, Dh, E), 1, 2) * scale         # (H, E, Dh), scale folded
    wk = jnp.swapaxes(in_w[E:2 * E].reshape(H, Dh, E), 1, 2)            # (H, E, Dh)
    wv = jnp.swapaxes(in_w[2 * E:].reshape(H, Dh, E), 1, 2)             # (H, E, Dh)
    w_qkv_heads = jnp.concatenate([wq, wk, wv], axis=2)                 # (H, E, 3Dh)

    bq = in_b[:E].reshape(H, 1, Dh) * scale
    bk = in_b[E:2 * E].reshape(H, 1, Dh)
    bv = in_b[2 * E:].reshape(H, 1, Dh)
    b_qkv_heads = jnp.concatenate([bq, bk, bv], axis=2)                 # (H, 1, 3Dh)

    wo_heads = params["out_proj_weight"].T.reshape(H, Dh, E)            # (H, Dh, E)
    bo = params["out_proj_bias"].reshape(1, E)

    kernel = partial(_mha_kernel, H, Dh, need_weights)
    full = lambda shape: pl.BlockSpec(shape, lambda b: (0,) * len(shape))

    out_shapes = [jax.ShapeDtypeStruct((B, S, E), x.dtype)]
    out_specs = [pl.BlockSpec((1, S, E), lambda b: (b, 0, 0))]
    if need_weights:
        out_shapes.append(jax.ShapeDtypeStruct((B, S, S), jnp.float32))
        out_specs.append(pl.BlockSpec((1, S, S), lambda b: (b, 0, 0)))

    results = pl.pallas_call(
        kernel,
        out_shape=tuple(out_shapes),
        grid_spec=pltpu.PrefetchScalarGridSpec(
            num_scalar_prefetch=0,
            grid=(B,),
            in_specs=[
                pl.BlockSpec((1, S, E), lambda b: (b, 0, 0)),   # x
                pl.BlockSpec((1, 1, S), lambda b: (b, 0, 0)),   # additive key mask
                full((H, E, 3 * Dh)),                           # fused QKV weights (per head)
                full((H, 1, 3 * Dh)),                           # fused QKV bias (per head)
                full((H, Dh, E)),                               # Wo^T, head-split
                full((1, E)),                                   # bo
            ],
            out_specs=out_specs,
        ),
        compiler_params=pltpu.CompilerParams(dimension_semantics=("parallel",)),
    )(x, mask_add, w_qkv_heads, b_qkv_heads, wo_heads, bo)

    if need_weights:
        return results
    return results[0]


def init_params(key, feature_dim):
    # Deterministic synthetic init (matches nn.MultiheadAttention parameter shapes).
    k1, k2, k3, k4 = jax.random.split(key, 4)
    bound = 1.0 / math.sqrt(feature_dim)
    return {
        "in_proj_weight": jax.random.uniform(
            k1, (3 * feature_dim, feature_dim), jnp.float32, -bound, bound),
        "in_proj_bias": jax.random.uniform(
            k3, (3 * feature_dim,), jnp.float32, -bound, bound),
        "out_proj_weight": jax.random.uniform(
            k2, (feature_dim, feature_dim), jnp.float32, -bound, bound),
        "out_proj_bias": jax.random.uniform(
            k4, (feature_dim,), jnp.float32, -bound, bound),
    }


if __name__ == "__main__":
    B, S, E, H = 2, 8, 32, 4
    key = jax.random.PRNGKey(0)
    kx, kp, km = jax.random.split(key, 3)

    x = jax.random.normal(kx, (B, S, E), dtype=jnp.float32)
    params = init_params(kp, E)
    # mask: True = valid sequence element (module forces position 0 valid).
    mask = jax.random.bernoulli(km, 0.7, (B, S))

    out, attn_w = transpose_multihead_attention(x, params, mask, num_heads=H)
    out = jax.block_until_ready(out)
    attn_w = jax.block_until_ready(attn_w)

    assert out.shape == (B, S, E)
    assert attn_w.shape == (B, S, S)
    assert bool(jnp.all(jnp.isfinite(out)))
    # Softmax rows should sum to ~1 (loose tolerance: approx reciprocal).
    assert bool(jnp.all(jnp.abs(jnp.sum(attn_w, axis=-1) - 1.0) < 1e-2))

    # need_weights=False path (skips the (B,S,S) output entirely).
    out_only = transpose_multihead_attention(x, params, mask, num_heads=H, need_weights=False)
    out_only = jax.block_until_ready(out_only)
    assert out_only.shape == (B, S, E)
    assert bool(jnp.allclose(out_only, out, atol=1e-5))

    print("KERNEL_OK")
</pallas_src>

<mosaic_0001>
module attributes {stable_mosaic.version = 11 : i64} {
  func.func @_mha_kernel(%arg0: i32, %arg1: memref<1x8x32xf32, #tpu.memory_space<vmem>>, %arg2: memref<1x1x8xf32, #tpu.memory_space<vmem>>, %arg3: memref<4x32x24xf32, #tpu.memory_space<vmem>>, %arg4: memref<4x1x24xf32, #tpu.memory_space<vmem>>, %arg5: memref<4x8x32xf32, #tpu.memory_space<vmem>>, %arg6: memref<1x32xf32, #tpu.memory_space<vmem>>, %arg7: memref<1x8x32xf32, #tpu.memory_space<vmem>>, %arg8: memref<1x8x8xf32, #tpu.memory_space<vmem>>) attributes {dimension_semantics = [#tpu.dimension_semantics<parallel>], iteration_bounds = array<i64: 2>, scalar_prefetch = 0 : i64, scratch_operands = 0 : i64, tpu.core_type = #tpu.core_type<tc>, window_params = [{transform_indices = @transform_0, window_bounds = array<i64: 1, 8, 32>}, {transform_indices = @transform_1, window_bounds = array<i64: 1, 1, 8>}, {pipeline_mode = #tpu.pipeline_mode<synchronous>, transform_indices = @transform_2, window_bounds = array<i64: 4, 32, 24>}, {pipeline_mode = #tpu.pipeline_mode<synchronous>, transform_indices = @transform_3, window_bounds = array<i64: 4, 1, 24>}, {pipeline_mode = #tpu.pipeline_mode<synchronous>, transform_indices = @transform_4, window_bounds = array<i64: 4, 8, 32>}, {pipeline_mode = #tpu.pipeline_mode<synchronous>, transform_indices = @transform_5, window_bounds = array<i64: 1, 32>}, {transform_indices = @transform_6, window_bounds = array<i64: 1, 8, 32>}, {transform_indices = @transform_7, window_bounds = array<i64: 1, 8, 8>}]} {
    %c0 = arith.constant 0 : index
    %c0_0 = arith.constant 0 : index
    %c0_1 = arith.constant 0 : index
    %0 = vector.load %arg1[%c0, %c0_0, %c0_1] : memref<1x8x32xf32, #tpu.memory_space<vmem>>, vector<1x8x32xf32>
    %1 = vector.shape_cast %0 : vector<1x8x32xf32> to vector<8x32xf32>
    %c0_2 = arith.constant 0 : index
    %c0_3 = arith.constant 0 : index
    %c0_4 = arith.constant 0 : index
    %2 = vector.load %arg2[%c0_2, %c0_3, %c0_4] : memref<1x1x8xf32, #tpu.memory_space<vmem>>, vector<1x1x8xf32>
    %3 = vector.shape_cast %1 : vector<8x32xf32> to vector<1x8x32xf32>
    %4 = vector.broadcast %3 : vector<1x8x32xf32> to vector<4x8x32xf32>
    %c0_5 = arith.constant 0 : index
    %c0_6 = arith.constant 0 : index
    %c0_7 = arith.constant 0 : index
    %5 = vector.load %arg3[%c0_5, %c0_6, %c0_7] : memref<4x32x24xf32, #tpu.memory_space<vmem>>, vector<4x32x24xf32>
    "tpu.trace_start"() <{level = 10 : i32, message = "hse,hef->hsf"}> : () -> ()
    %cst = arith.constant dense<0.000000e+00> : vector<4x8x24xf32>
    %6 = tpu.matmul %4, %5, %cst {dimension_numbers = #tpu.dot_dimension_numbers<[2], [1], [1], [2], [0, 0, 0, 1, 1, 2], [0], [0]>} : vector<4x8x32xf32>, vector<4x32x24xf32>, vector<4x8x24xf32> -> vector<4x8x24xf32>
    "tpu.trace_stop"() : () -> ()
    %c0_8 = arith.constant 0 : index
    %c0_9 = arith.constant 0 : index
    %c0_10 = arith.constant 0 : index
    %7 = vector.load %arg4[%c0_8, %c0_9, %c0_10] : memref<4x1x24xf32, #tpu.memory_space<vmem>>, vector<4x1x24xf32>
    %8 = vector.broadcast %7 : vector<4x1x24xf32> to vector<4x8x24xf32>
    %9 = arith.addf %6, %8 : vector<4x8x24xf32>
    %10 = vector.extract_strided_slice %9 {offsets = [0, 0, 0], sizes = [4, 8, 8], strides = [1, 1, 1]} : vector<4x8x24xf32> to vector<4x8x8xf32>
    %11 = vector.extract_strided_slice %9 {offsets = [0, 0, 8], sizes = [4, 8, 8], strides = [1, 1, 1]} : vector<4x8x24xf32> to vector<4x8x8xf32>
    %12 = vector.extract_strided_slice %9 {offsets = [0, 0, 16], sizes = [4, 8, 8], strides = [1, 1, 1]} : vector<4x8x24xf32> to vector<4x8x8xf32>
    "tpu.trace_start"() <{level = 10 : i32, message = "hqd,hkd->hqk"}> : () -> ()
    %cst_11 = arith.constant dense<0.000000e+00> : vector<4x8x8xf32>
    %13 = tpu.matmul %10, %11, %cst_11 {dimension_numbers = #tpu.dot_dimension_numbers<[2], [2], [1], [1], [0, 0, 0, 1, 1, 1], [0], [0]>} : vector<4x8x8xf32>, vector<4x8x8xf32>, vector<4x8x8xf32> -> vector<4x8x8xf32>
    "tpu.trace_stop"() : () -> ()
    %14 = vector.broadcast %2 : vector<1x1x8xf32> to vector<4x8x8xf32>
    %15 = arith.addf %13, %14 : vector<4x8x8xf32>
    %cst_12 = arith.constant dense<0xFF800000> : vector<4x8xf32>
    %16 = vector.multi_reduction <maximumf>, %15, %cst_12 [2] : vector<4x8x8xf32> to vector<4x8xf32>
    %17 = vector.shape_cast %16 : vector<4x8xf32> to vector<4x8x1xf32>
    %18 = vector.broadcast %17 : vector<4x8x1xf32> to vector<4x8x8xf32>
    %19 = arith.subf %15, %18 : vector<4x8x8xf32>
    %20 = math.exp %19 : vector<4x8x8xf32>
    %cst_13 = arith.constant dense<0.000000e+00> : vector<4x8xf32>
    %21 = vector.multi_reduction <add>, %20, %cst_13 [2] : vector<4x8x8xf32> to vector<4x8xf32>
    %22 = vector.shape_cast %21 : vector<4x8xf32> to vector<4x8x1xf32>
    %23 = tpu.reciprocal %22 {approx = true} : vector<4x8x1xf32> -> vector<4x8x1xf32>
    %24 = vector.broadcast %23 : vector<4x8x1xf32> to vector<4x8x8xf32>
    %25 = arith.mulf %20, %24 : vector<4x8x8xf32>
    "tpu.trace_start"() <{level = 10 : i32, message = "hqk,hkd->hqd"}> : () -> ()
    %cst_14 = arith.constant dense<0.000000e+00> : vector<4x8x8xf32>
    %26 = tpu.matmul %25, %12, %cst_14 {dimension_numbers = #tpu.dot_dimension_numbers<[2], [1], [1], [2], [0, 0, 0, 1, 1, 2], [0], [0]>} : vector<4x8x8xf32>, vector<4x8x8xf32>, vector<4x8x8xf32> -> vector<4x8x8xf32>
    "tpu.trace_stop"() : () -> ()
    %c0_15 = arith.constant 0 : index
    %c0_16 = arith.constant 0 : index
    %c0_17 = arith.constant 0 : index
    %27 = vector.load %arg5[%c0_15, %c0_16, %c0_17] : memref<4x8x32xf32, #tpu.memory_space<vmem>>, vector<4x8x32xf32>
    "tpu.trace_start"() <{level = 10 : i32, message = "hqd,hde->hqe"}> : () -> ()
    %cst_18 = arith.constant dense<0.000000e+00> : vector<4x8x32xf32>
    %28 = tpu.matmul %26, %27, %cst_18 {dimension_numbers = #tpu.dot_dimension_numbers<[2], [1], [1], [2], [0, 0, 0, 1, 1, 2], [0], [0]>} : vector<4x8x8xf32>, vector<4x8x32xf32>, vector<4x8x32xf32> -> vector<4x8x32xf32>
    "tpu.trace_stop"() : () -> ()
    %cst_19 = arith.constant dense<0.000000e+00> : vector<8x32xf32>
    %29 = vector.multi_reduction <add>, %28, %cst_19 [0] : vector<4x8x32xf32> to vector<8x32xf32>
    %c0_20 = arith.constant 0 : index
    %c0_21 = arith.constant 0 : index
    %30 = vector.load %arg6[%c0_20, %c0_21] : memref<1x32xf32, #tpu.memory_space<vmem>>, vector<1x32xf32>
    %31 = vector.broadcast %30 : vector<1x32xf32> to vector<8x32xf32>
    %32 = arith.addf %29, %31 : vector<8x32xf32>
    %c0_22 = arith.constant 0 : index
    %c0_23 = arith.constant 0 : index
    %c0_24 = arith.constant 0 : index
    %33 = vector.load %arg7[%c0_22, %c0_23, %c0_24] : memref<1x8x32xf32, #tpu.memory_space<vmem>>, vector<1x8x32xf32>
    %34 = vector.shape_cast %33 : vector<1x8x32xf32> to vector<8x32xf32>
    %35 = vector.shape_cast %32 : vector<8x32xf32> to vector<1x8x32xf32>
    tpu.vector_store %arg7[%c0_22, %c0_23, %c0_24], %35 {strides = array<i32>} : memref<1x8x32xf32, #tpu.memory_space<vmem>>, vector<1x8x32xf32>,
    %cst_25 = arith.constant dense<0.000000e+00> : vector<8x8xf32>
    %36 = vector.multi_reduction <add>, %25, %cst_25 [0] : vector<4x8x8xf32> to vector<8x8xf32>
    %cst_26 = arith.constant 2.500000e-01 : f32
    %37 = vector.broadcast %cst_26 : f32 to vector<8x8xf32>
    %38 = arith.mulf %36, %37 : vector<8x8xf32>
    %c0_27 = arith.constant 0 : index
    %c0_28 = arith.constant 0 : index
    %c0_29 = arith.constant 0 : index
    %39 = vector.load %arg8[%c0_27, %c0_28, %c0_29] : memref<1x8x8xf32, #tpu.memory_space<vmem>>, vector<1x8x8xf32>
    %40 = vector.shape_cast %39 : vector<1x8x8xf32> to vector<8x8xf32>
    %41 = vector.shape_cast %38 : vector<8x8xf32> to vector<1x8x8xf32>
    tpu.vector_store %arg8[%c0_27, %c0_28, %c0_29], %41 {strides = array<i32>} : memref<1x8x8xf32, #tpu.memory_space<vmem>>, vector<1x8x8xf32>,
    return
  }
  func.func @transform_0(%arg0: i32) -> (i32, i32, i32) {
    %c0_i32 = arith.constant 0 : i32
    %c0_i32_0 = arith.constant 0 : i32
    %c0_i32_1 = arith.constant 0 : i32
    return %arg0, %c0_i32, %c0_i32_0 : i32, i32, i32
  }
  func.func @transform_1(%arg0: i32) -> (i32, i32, i32) {
    %c0_i32 = arith.constant 0 : i32
    %c0_i32_0 = arith.constant 0 : i32
    %c0_i32_1 = arith.constant 0 : i32
    return %arg0, %c0_i32, %c0_i32_0 : i32, i32, i32
  }
  func.func @transform_2(%arg0: i32) -> (i32, i32, i32) {
    %c0_i32 = arith.constant 0 : i32
    %c0_i32_0 = arith.constant 0 : i32
    %c0_i32_1 = arith.constant 0 : i32
    %c0_i32_2 = arith.constant 0 : i32
    return %c0_i32, %c0_i32_0, %c0_i32_1 : i32, i32, i32
  }
  func.func @transform_3(%arg0: i32) -> (i32, i32, i32) {
    %c0_i32 = arith.constant 0 : i32
    %c0_i32_0 = arith.constant 0 : i32
    %c0_i32_1 = arith.constant 0 : i32
    %c0_i32_2 = arith.constant 0 : i32
    return %c0_i32, %c0_i32_0, %c0_i32_1 : i32, i32, i32
  }
  func.func @transform_4(%arg0: i32) -> (i32, i32, i32) {
    %c0_i32 = arith.constant 0 : i32
    %c0_i32_0 = arith.constant 0 : i32
    %c0_i32_1 = arith.constant 0 : i32
    %c0_i32_2 = arith.constant 0 : i32
    return %c0_i32, %c0_i32_0, %c0_i32_1 : i32, i32, i32
  }
  func.func @transform_5(%arg0: i32) -> (i32, i32) {
    %c0_i32 = arith.constant 0 : i32
    %c0_i32_0 = arith.constant 0 : i32
    %c0_i32_1 = arith.constant 0 : i32
    return %c0_i32, %c0_i32_0 : i32, i32
  }
  func.func @transform_6(%arg0: i32) -> (i32, i32, i32) {
    %c0_i32 = arith.constant 0 : i32
    %c0_i32_0 = arith.constant 0 : i32
    %c0_i32_1 = arith.constant 0 : i32
    return %arg0, %c0_i32, %c0_i32_0 : i32, i32, i32
  }
  func.func @transform_7(%arg0: i32) -> (i32, i32, i32) {
    %c0_i32 = arith.constant 0 : i32
    %c0_i32_0 = arith.constant 0 : i32
    %c0_i32_1 = arith.constant 0 : i32
    return %arg0, %c0_i32, %c0_i32_0 : i32, i32, i32
  }
}

</mosaic_0001>

<bundles_post_ra>
// kernel: tpu_custom_call.1
= control target key start
LH: loop header
LB: loop body
LE: loop exit
PB: predicated region body
PF: predicated region fallthrough
CT: control target
= control target key end

     0   :  { %13 = vsyncpa [#allocation3], 0  ;;  %s2452_s0 = inlined_call_operand.vmem [shape: f32[2,8,32], index: 0, kind: input, shape index: {}]   ;;  %s2453_s1 = inlined_call_operand.vmem [shape: f32[2,1,8], index: 1, kind: input, shape index: {}]   ;;  %s2454_s2 = inlined_call_operand.vmem [shape: f32[4,32,24], index: 2, kind: input, shape index: {}]   ;;  %s2455_s3 = inlined_call_operand.vmem [shape: f32[4,1,24], index: 3, kind: input, shape index: {}]   ;;  %s2456_s4 = inlined_call_operand.vmem [shape: f32[4,8,32], index: 4, kind: input, shape index: {}]   ;;  %s2457_s5 = inlined_call_operand.vmem [shape: f32[1,32], index: 5, kind: input, shape index: {}]   ;;  %s2458_s6 = inlined_call_operand.hbm [shape: f32[2,8,32], index: 6, kind: output, shape index: {0}]   ;;  %s2459_s7 = inlined_call_operand.hbm [shape: f32[2,8,8], index: 7, kind: output, shape index: {1}]  }
   0x1   :  { %15 = vsyncpa [#allocation3 + $0x1], 0 }
   0x2   :  { %16 = vsyncpa [#allocation5], 0 }
   0x3   :  { %18 = vsyncpa [#allocation5 + $0x1], 0  ;;  %s2134_s24 = smov 0   ;;  %s2136_s25 = smov 0  }
   0x4   :  { %s2138_s26 = smov 0   ;;  %s2140_s27 = smov 0  }
   0x5 LB: > { %s2155_s28 = sadd.s32 4294967295, %s2086_s27   ;;  %s1745_s29 = sadd.s32 4294967294, %s2086_s27   ;;  %s2086_s27 = sphi %s2140_s27, %s2469_s27   ;;  %s2082_s26 = sphi %s2138_s26, %s2468_s26   ;;  %s2078_s25 = sphi %s2136_s25, %s2467_s25   ;;  %s2074_s24 = sphi %s2134_s24, %s2466_s24  }
   0x6   : > { %s2159_s30 = sadd.s32 1, %s2086_s27   ;;  %s167_s8 = sadd.s32 1, %s2082_s26 }
   0x7   : > { %s164_s9 = ssub.s32 %s2086_s27, %s2159_s30  ;;  %p177_p0 = scmp.ne.s32.totalorder %s2082_s26, %s2078_s25 }
   0x8   : > { %p165_p1 = scmp.eq.s32.totalorder %s164_s9, 0  ;;  %p178_p2 = scmp.eq.s32.totalorder %s2155_s28, 1 }
   0x9   : > { %p183_p3 = scmp.ne.s32.totalorder %s2078_s25, %s2074_s24  ;;  %p184_p4 = scmp.eq.s32.totalorder %s1745_s29, 1 }
   0xa   : > { %s2170_s10 = scalar_select %p165_p1, %s2082_s26, %s167_s8  }
   0xb   : > { %p2172_p5 = por %p178_p2, %p177_p0  ;;  %p2176_p6 = por %p184_p4, %p183_p3 }
   0xc   : > { %p1748_p7 = scmp.ge.s32.totalorder %s2086_s27, 1  ;;  %p253_p8 = scmp.lt.s32.totalorder %s2086_s27, 3 }
   0xe   : > { %p254_p9 = pnand %p1748_p7, %p253_p8 }
   0xf   : > { %p292_p10 = scmp.lt.s32.totalorder (!%p254_p9), %s2155_s28, 1  ;;  %s2090_s14 = smov (!%p254_p9), 120  }
  0x10   : > { %257 = sbr.rel (%p254_p9) target bundleno = 1267 (0x4f3), region = 44  ;;  %s2348_s23 = sand.u32 (!%p254_p9), 1, %s2078_s25  }
  0x11   : > { %s2461_s29 = sshll.u32 (!%p254_p9), %s2348_s23, 3  ;;  %s2460_s20 = sshll.u32 (!%p254_p9), %s2155_s28, 7 }
  0x12   : > { %s2361_s8 = scalar_lea.vmem (!%p254_p9), [#allocation4], %s2461_s29  ;;  %s2092_s16 = smov (!%p254_p9), [#allocation4]  }
  0x13   : > { %s1645_s13 = sshll.u32 (!%p254_p9), %s2361_s8, 4  ;;  %s1646_s13 = int_to_ptr.vmem [resolvable:$true] %s1645_s13 }
  0x14   : > { %s1996_s15 = scalar_lea.vmem (!%p254_p9), %s1646_s13, 128 }
  0x15   : > { %v304_v0 = vld [vmem:[%s2454_s2 + $0x18] sm:$0xff]  ;;  %v2088_v2 = vmov 0.0   ;;  %v303_v3 = vld [vmem:[%s2454_s2 + $0x10] sm:$0xff]  ;;  %s2198_s21 = scalar_select %p292_p10, %s2155_s28, 1  ;;  %v302_v5 = vld [vmem:[%s2454_s2 + $0x8] sm:$0xff]  ;;  %vm2089_vm0 = vmmov 0  }
  0x16   : > { %v308_v1 = vld [vmem:[%s2454_s2 + $0x38] sm:$0xff]  ;;  %1828 = vmatprep.subr.mxu0 %v2088_v2  ;;  %1839 = vmatprep.subr.mxu1 %v2088_v2  ;;  %v307_v4 = vld [vmem:[%s2454_s2 + $0x30] sm:$0xff]  ;;  %v306_v6 = vld [vmem:[%s2454_s2 + $0x28] sm:$0xff]  ;;  %vm345_vm1 = vcmask 261120   ;;  %vm638_vm2 = vcmask 64512   ;;  %p1997_p11 = scmp.ne.s32.totalorder %s1646_s13, %s1996_s15 }
  0x17   : > { %1829 = vmatpush3.msra.mxu0 %v304_v0  ;;  %1840 = vmatpush3.msra.mxu1 %v308_v1  ;;  %s1751_s9 = sshll.u32 %s2198_s21, 3  ;;  %v301_v7 = vld [vmem:[%s2454_s2] sm:$0xff]  ;;  %v312_v10 = vld [vmem:[%s2454_s2 + $0x58] sm:$0xff]  ;;  %v311_v11 = vld [vmem:[%s2454_s2 + $0x50] sm:$0xff]  ;;  %s298_s22 = scalar_lea.vmem %s2453_s1, %s2198_s21 }
  0x18   : > { %1830 = vmatprep.subr.mxu0 %v2088_v2  ;;  %1841 = vmatprep.subr.mxu1 %v2088_v2  ;;  %s295_s17 = scalar_lea.vmem %s2452_s0, %s1751_s9  ;;  %v305_v9 = vld [vmem:[%s2454_s2 + $0x20] sm:$0xff]  ;;  %v316_v12 = vld [vmem:[%s2454_s2 + $0x78] sm:$0xff]  ;;  %v310_v13 = vld [vmem:[%s2454_s2 + $0x48] sm:$0xff]  ;;  %s2091_s21 = smov 112  }
  0x19   : > { %1831 = vmatpush3.msra.mxu0 %v303_v3  ;;  %1842 = vmatpush3.msra.mxu1 %v307_v4  ;;  %v299_v8 = vld [vmem:[%s295_s17] sm:$0xff]  ;;  %v315_v14 = vld [vmem:[%s2454_s2 + $0x70] sm:$0xff]  ;;  %v314_v16 = vld [vmem:[%s2454_s2 + $0x68] sm:$0xff]  ;;  %s1643_s9 = scalar_lea.hbm %s2459_s7, %s2460_s20  ;;  %p1998_p12 = pnand %p1997_p11, %p2172_p5 }
  0x1a   : > { %1832 = vmatprep.subr.mxu0 %v2088_v2  ;;  %1843 = vmatprep.subr.mxu1 %v2088_v2  ;;  %v309_v15 = vld [vmem:[%s2454_s2 + $0x40] sm:$0xff]  ;;  %s2000_s17 = sshll.u32 %s2092_s16, 4  ;;  %s2001_s17 = int_to_ptr.vmem [resolvable:$false] %s2000_s17 }
  0x1b   : > { %1833 = vmatpush3.msra.mxu0 %v302_v5  ;;  %1836 = vmatprep.mubr.msk.f32.mxu0 %vm2089_vm0, %v2088_v2  ;;  %v313_v17 = vld [vmem:[%s2454_s2 + $0x60] sm:$0xff]  ;;  %p1999_p13 = pneg %p1998_p12  ;;  %s2002_s18 = scalar_lea.vmem %s2001_s17, 256 }
  0x1c   : > { %1834 = vmatprep.subr.mxu0 %v2088_v2  ;;  %1844 = vmatpush3.msra.mxu1 %v306_v6  ;;  %v1752_v18 = vld [vmem:[%s2455_s3] ss:$0 sm:$0xff]  ;;  %v1753_v21 = vld [vmem:[%s2455_s3 + $0x1] ss:$0 sm:$0xff]  ;;  %v1754_v26 = vld [vmem:[%s2455_s3 + $0x2] ss:$0 sm:$0xff]  ;;  %p2003_p0 = scmp.lt.s32.totalorder %s1646_s13, %s2001_s17  ;;  %p2004_p1 = scmp.lt.s32.totalorder %s2002_s18, %s1996_s15 }
  0x1d   : > { %1835 = vmatpush3.msra.mxu0 %v301_v7  ;;  %1845 = vmatprep.subr.mxu1 %v2088_v2  ;;  %v1755_v29 = vld [vmem:[%s2455_s3 + $0x3] ss:$0 sm:$0xff]  ;;  %v1760_v38 = vld [vmem:[%s298_s22] ss:$0 sm:$0xff] }
  0x1e   : > { %1837 = vmatmul.mubr.msk.f32.vlgmr.msra.gmra.mxu0 %vm345_vm1, %v299_v8  ;;  %1850 = vmatprep.subr.mxu0 %v2088_v2  ;;  %p2005_p2 = por %p2004_p1, %p2003_p0 }
  0x1f   : > { %1846 = vmatpush3.msra.mxu1 %v305_v9  ;;  %1851 = vmatpush3.msra.mxu0 %v312_v10 }
  0x20   : > { %1847 = vmatprep.mubr.msk.f32.mxu1 %vm2089_vm0, %v2088_v2  ;;  %1852 = vmatprep.subr.mxu0 %v2088_v2  ;;  %p2006_p3 = pnand %p2005_p2, %p1999_p13 }
  0x21   : > { %1861 = vmatprep.subr.mxu1 %v2088_v2  ;;  %1848 = vmatmul.mubr.msk.f32.vlgmr.msra.gmra.mxu1 %vm345_vm1, %v299_v8 }
  0x22   : > { %1853 = vmatpush3.msra.mxu0 %v311_v11  ;;  %1862 = vmatpush3.msra.mxu1 %v316_v12 }
  0x23   : > { %1854 = vmatprep.subr.mxu0 %v2088_v2  ;;  %1863 = vmatprep.subr.mxu1 %v2088_v2 }
  0x24   : > { %1855 = vmatpush3.msra.mxu0 %v310_v13  ;;  %1864 = vmatpush3.msra.mxu1 %v315_v14 }
  0x25   : > { %1856 = vmatprep.subr.mxu0 %v2088_v2  ;;  %1865 = vmatprep.subr.mxu1 %v2088_v2 }
  0x26   : > { %1857 = vmatpush3.msra.mxu0 %v309_v15  ;;  %1858 = vmatprep.mubr.msk.f32.mxu0 %vm2089_vm0, %v2088_v2 }
  0x27   : > { %1866 = vmatpush3.msra.mxu1 %v314_v16  ;;  %1859 = vmatmul.mubr.msk.f32.vlgmr.msra.gmra.mxu0 %vm345_vm1, %v299_v8 }
  0x28   : > { %1867 = vmatprep.subr.mxu1 %v2088_v2  ;;  %1869 = vmatprep.mubr.msk.f32.mxu1 %vm2089_vm0, %v2088_v2 }
  0x29   : > { %1868 = vmatpush3.msra.mxu1 %v313_v17  ;;  %1872 = vmatprep.subr.mxu0 %v2088_v2 }
  0x2a   : > { %1870 = vmatmul.mubr.msk.f32.vlgmr.msra.gmra.mxu1 %vm345_vm1, %v299_v8  ;;  %1874 = vmatprep.mubr.msk.f32.mxu0 %vm2089_vm0, %v2088_v2 }
  0x2b   : > { %1877 = vmatprep.subr.mxu1 %v2088_v2  ;;  %1879 = vmatprep.mubr.msk.f32.mxu1 %vm2089_vm0, %v2088_v2 }
  0xde   : > { %v415_v19 = vpop.f32.mrf.mxu0 }
  0xdf   : > { %v416_v20 = vadd.f32 %v1752_v18, %v415_v19 }
  0xe0   : > { %v1838_v22 = vpop.f32.mrf.mxu0 }
  0xe1   : > { %v485_v23 = vpop.f32.mrf.mxu1  ;;  %636 = vrot.lane.b32.xlu0 %v416_v20, %s2090_s14 }
  0xe2   : > { %v2278_v24 = vadd.f32 %v1753_v21, %v485_v23 }
  0xe3   : > { %v1849_v25 = vpop.f32.mrf.mxu1 }
  0xe5   : > { %714 = vrot.lane.b32.xlu0 %v2278_v24, %s2090_s14 }
  0xe7   : > { %v555_v27 = vpop.f32.mrf.mxu0 }
  0xe8   : > { %v2284_v28 = vadd.f32 %v1754_v26, %v555_v27 }
  0xe9   : > { %v1860_v30 = vpop.f32.mrf.mxu0 }
  0xea   : > { %v625_v31 = vpop.f32.mrf.mxu1  ;;  %791 = vrot.lane.b32.xlu1 %v2284_v28, %s2090_s14 }
  0xeb   : > { %v2290_v32 = vadd.f32 %v1755_v29, %v625_v31 }
  0xec   : > { %v1871_v33 = vpop.f32.mrf.mxu1 }
  0xee   : > { %868 = vrot.lane.b32.xlu1 %v2290_v32, %s2090_s14  ;;  %s1619_s14 = scalar_lea.sflag [#allocation5], %s2348_s23 }
 0x153   : > { %v637_v34 = vpop.permute.xlu0 %636 }
 0x154   : > { %1873 = vmatpush3.xpose.msk.msra.mxu0 %vm638_vm2, %v637_v34 }
 0x155   : > { %1882 = vmatprep.subr.mxu0 %v2088_v2 }
 0x157   : > { %1875 = vmatmul.mubr.msk.f32.vlgmr.msra.gmra.mxu0 %vm638_vm2, %v416_v20  ;;  %v715_v35 = vpop.permute.xlu0 %714 }
 0x158   : > { %1878 = vmatpush3.xpose.msk.msra.mxu1 %vm638_vm2, %v715_v35  ;;  %1884 = vmatprep.mubr.msk.f32.mxu0 %vm2089_vm0, %v2088_v2 }
 0x159   : > { %1887 = vmatprep.subr.mxu1 %v2088_v2 }
 0x15b   : > { %1880 = vmatmul.mubr.msk.f32.vlgmr.msra.gmra.mxu1 %vm638_vm2, %v2278_v24 }
 0x15c   : > { %v792_v36 = vpop.permute.xlu1 %791  ;;  %1889 = vmatprep.mubr.msk.f32.mxu1 %vm2089_vm0, %v2088_v2 }
 0x15d   : > { %1883 = vmatpush3.xpose.msk.msra.mxu0 %vm638_vm2, %v792_v36  ;;  %v1292_v36 = vld [vmem:[%s2456_s4] sm:$0xff] }
 0x15e   : > { %1892 = vmatprep.subr.mxu0 %v2088_v2 }
 0x160   : > { %1885 = vmatmul.mubr.msk.f32.vlgmr.msra.gmra.mxu0 %vm638_vm2, %v2284_v28  ;;  %v869_v37 = vpop.permute.xlu1 %868 }
 0x161   : > { %1888 = vmatpush3.xpose.msk.msra.mxu1 %vm638_vm2, %v869_v37  ;;  %1894 = vmatprep.mubr.msk.f32.mxu0 %vm2089_vm0, %v2088_v2  ;;  %v1293_v37 = vld [vmem:[%s2456_s4 + $0x8] sm:$0xff] }
 0x162   : > { %1897 = vmatprep.subr.mxu1 %v2088_v2 }
 0x164   : > { %1890 = vmatmul.mubr.msk.f32.vlgmr.msra.gmra.mxu1 %vm638_vm2, %v2290_v32 }
 0x165   : > { %1899 = vmatprep.mubr.msk.f32.mxu1 %vm2089_vm0, %v2088_v2 }
 0x217   : > { %v709_v39 = vpop.f32.mrf.mxu0 }
 0x218   : > { %v710_v40 = vadd.f32 %v1760_v38, %v709_v39 }
 0x219   : > { %v1876_v41 = vpop.f32.mrf.mxu0 }
 0x21a   : > { %v944_v42 = vsel %vm638_vm2, %v710_v40, -inf  ;;  %v1295_v41 = vld [vmem:[%s2456_s4 + $0x18] sm:$0xff] }
 0x21b   : > { %v786_v43 = vpop.f32.mrf.mxu1  ;;  %945 = vmax.xlane.f32.xlu0 %v944_v42 }
 0x21c   : > { %v787_v44 = vadd.f32 %v1760_v38, %v786_v43 }
 0x21d   : > { %v1881_v45 = vpop.f32.mrf.mxu1 }
 0x21e   : > { %v947_v46 = vsel %vm638_vm2, %v787_v44, -inf }
 0x21f   : > { %948 = vmax.xlane.f32.xlu1 %v947_v46 }
 0x220   : > { %v863_v47 = vpop.f32.mrf.mxu0 }
 0x221   : > { %v864_v48 = vadd.f32 %v1760_v38, %v863_v47 }
 0x222   : > { %v1886_v49 = vpop.f32.mrf.mxu0 }
 0x223   : > { %v950_v50 = vsel %vm638_vm2, %v864_v48, -inf }
 0x224   : > { %v940_v51 = vpop.f32.mrf.mxu1  ;;  %951 = vmax.xlane.f32.xlu0 %v950_v50 }
 0x225   : > { %v941_v52 = vadd.f32 %v1760_v38, %v940_v51  ;;  %v1294_v38 = vld [vmem:[%s2456_s4 + $0x10] sm:$0xff] }
 0x226   : > { %v1891_v53 = vpop.f32.mrf.mxu1 }
 0x227   : > { %v953_v54 = vsel %vm638_vm2, %v941_v52, -inf }
 0x228   : > { %954 = vmax.xlane.f32.xlu0 %v953_v54 }
 0x230   : > { %988 = vrot.lane.b32.xlu1 %v416_v20, %s2091_s21 }
 0x2a4   : > { %v946_v55 = vpop.xlane.xlu0 %945 }
 0x2a5   : > { %v956_v56 = vsub.f32 %v710_v40, %v946_v55 }
 0x2a7   : > { %v960_v57 = vmul.f32 1.442695, %v956_v56 }
 0x2a8   : > { %v949_v58 = vpop.xlane.xlu1 %948 }
 0x2a9   : > { %1980 = vpow2.f32 %v960_v57  ;;  %v957_v59 = vsub.f32 %v787_v44, %v949_v58 }
 0x2ab   : > { %v962_v60 = vmul.f32 1.442695, %v957_v59 }
 0x2ac   : > { %v989_v61 = vpop.permute.xlu1 %988 }
 0x2ad   : > { %1982 = vpow2.f32 %v962_v60  ;;  %v952_v62 = vpop.xlane.xlu0 %951  ;;  %1893 = vmatpush3.msra.mxu0 %v989_v61 }
 0x2ae   : > { %v958_v63 = vsub.f32 %v864_v48, %v952_v62  ;;  %1902 = vmatprep.subr.mxu0 %v2088_v2 }
 0x2b0   : > { %v964_v0 = vmul.f32 1.442695, %v958_v63 }
 0x2b1   : > { %v955_v1 = vpop.xlane.xlu0 %954 }
 0x2b2   : > { %1984 = vpow2.f32 %v964_v0  ;;  %v959_v3 = vsub.f32 %v941_v52, %v955_v1 }
 0x2b4   : > { %v966_v4 = vmul.f32 1.442695, %v959_v3 }
 0x2b6   : > { %v1981_v5 = vpop.eup %1980  ;;  %1986 = vpow2.f32 %v966_v4 }
 0x2b7   : > { %v968_v6 = vsel %vm638_vm2, %v1981_v5, 0.0 }
 0x2b8   : > { %969 = vadd.xlane.f32.xlu1 %v968_v6 }
 0x2ba   : > { %v1983_v7 = vpop.eup %1982 }
 0x2bb   : > { %v971_v8 = vsel %vm638_vm2, %v1983_v7, 0.0 }
 0x2bc   : > { %972 = vadd.xlane.f32.xlu0 %v971_v8 }
 0x2bf   : > { %v1985_v9 = vpop.eup %1984 }
 0x2c0   : > { %v974_v10 = vsel %vm638_vm2, %v1985_v9, 0.0 }
 0x2c1   : > { %975 = vadd.xlane.f32.xlu1 %v974_v10 }
 0x2c3   : > { %v1987_v11 = vpop.eup %1986 }
 0x2c4   : > { %v977_v12 = vsel %vm638_vm2, %v1987_v11, 0.0 }
 0x2c5   : > { %978 = vadd.xlane.f32.xlu0 %v977_v12 }
 0x2d2   : > { %1140 = vrot.lane.b32.xlu1 %v2284_v28, %s2091_s21 }
 0x2d6   : > { %1216 = vrot.lane.b32.xlu1 %v2290_v32, %s2091_s21 }
 0x2db   : > { %1064 = vrot.lane.b32.xlu0 %v2278_v24, %s2091_s21 }
 0x341   : > { %v970_v13 = vpop.xlane.xlu1 %969 }
 0x342   : > { %1988 = vrcp.f32 %v970_v13 }
 0x345   : > { %v973_v14 = vpop.xlane.xlu0 %972 }
 0x346   : > { %1990 = vrcp.f32 %v973_v14 }
 0x34a   : > { %v976_v15 = vpop.xlane.xlu1 %975 }
 0x34b   : > { %1992 = vrcp.f32 %v976_v15 }
 0x34e   : > { %v979_v16 = vpop.xlane.xlu0 %978  ;;  %v1141_v18 = vpop.permute.xlu1 %1140 }
 0x34f   : > { %v1989_v17 = vpop.eup %1988  ;;  %1994 = vrcp.f32 %v979_v16 }
 0x350   : > { %v984_v19 = vmul.f32 %v1989_v17, %v1981_v5 }
 0x352   : > { %v1065_v20 = vpop.permute.xlu0 %1064  ;;  %1895 = vmatmul.mubr.msk.f32.vlgmr.msra.gmra.mxu0 %vm638_vm2, %v984_v19  ;;  %v1217_v23 = vpop.permute.xlu1 %1216  ;;  %v1604_v27 = vsel %vm638_vm2, %v984_v19, 0.0 }
 0x353   : > { %v1991_v21 = vpop.eup %1990  ;;  %1898 = vmatpush3.msra.mxu1 %v1065_v20  ;;  %1903 = vmatpush3.msra.mxu0 %v1141_v18 }
 0x354   : > { %1907 = vmatprep.subr.mxu1 %v2088_v2  ;;  %v985_v22 = vmul.f32 %v1991_v21, %v1983_v7  ;;  %1904 = vmatprep.mubr.msk.f32.mxu0 %vm2089_vm0, %v2088_v2 }
 0x355   : > { %1912 = vmatprep.subr.mxu0 %v2088_v2 }
 0x356   : > { %1900 = vmatmul.mubr.msk.f32.vlgmr.msra.gmra.mxu1 %vm638_vm2, %v985_v22  ;;  %v1605_v26 = vsel %vm638_vm2, %v985_v22, 0.0 }
 0x357   : > { %1908 = vmatpush3.msra.mxu1 %v1217_v23  ;;  %1909 = vmatprep.mubr.msk.f32.mxu1 %vm2089_vm0, %v2088_v2  ;;  %v1606_v30 = vadd.f32 %v1605_v26, %v1604_v27 }
 0x358   : > { %v1993_v24 = vpop.eup %1992  ;;  %1917 = vmatprep.subr.mxu1 %v2088_v2 }
 0x359   : > { %v986_v25 = vmul.f32 %v1993_v24, %v1985_v9 }
 0x35b   : > { %1905 = vmatmul.mubr.msk.f32.vlgmr.msra.gmra.mxu0 %vm638_vm2, %v986_v25  ;;  %v1607_v28 = vsel %vm638_vm2, %v986_v25, 0.0 }
 0x35c   : > { %v1995_v29 = vpop.eup %1994  ;;  %1914 = vmatprep.mubr.msk.f32.mxu0 %vm2089_vm0, %v2088_v2  ;;  %v1608_v32 = vadd.f32 %v1607_v28, %v1606_v30  ;;  %1913 = vmatpush3.msra.mxu0 %v1292_v36 }
 0x35d   : > { %v987_v31 = vmul.f32 %v1995_v29, %v1987_v11  ;;  %1922 = vmatprep.subr.mxu0 %v2088_v2 }
 0x35f   : > { %1910 = vmatmul.mubr.msk.f32.vlgmr.msra.gmra.mxu1 %vm638_vm2, %v987_v31  ;;  %v1609_v33 = vsel %vm638_vm2, %v987_v31, 0.0 }
 0x360   : > { %1919 = vmatprep.mubr.msk.f32.mxu1 %vm2089_vm0, %v2088_v2  ;;  %v1610_v34 = vadd.f32 %v1609_v33, %v1608_v32  ;;  %1918 = vmatpush3.msra.mxu1 %v1293_v37 }
 0x361   : > { %1927 = vmatprep.subr.mxu1 %v2088_v2 }
 0x362   : > { %v1611_v35 = vmul.f32 0.25, %v1610_v34 }
 0x364   : > { %1612 = vst.msk [vmem:[%s2361_s8] sm:$0xff] %vm638_vm2, %v1611_v35 }
 0x412   : > { %v1060_v39 = vpop.f32.mrf.mxu0 }
 0x413   : > { %1915 = vmatmul.mubr.msk.f32.vlgmr.msra.gmra.mxu0 %vm638_vm2, %v1060_v39 }
 0x414   : > { %v1896_v40 = vpop.f32.mrf.mxu0  ;;  %1923 = vmatpush3.msra.mxu0 %v1294_v38  ;;  %1924 = vmatprep.mubr.msk.f32.mxu0 %vm2089_vm0, %v2088_v2 }
 0x416   : > { %v1136_v42 = vpop.f32.mrf.mxu1 }
 0x417   : > { %1920 = vmatmul.mubr.msk.f32.vlgmr.msra.gmra.mxu1 %vm638_vm2, %v1136_v42 }
 0x418   : > { %v1901_v43 = vpop.f32.mrf.mxu1  ;;  %1928 = vmatpush3.msra.mxu1 %v1295_v41  ;;  %1929 = vmatprep.mubr.msk.f32.mxu1 %vm2089_vm0, %v2088_v2 }
 0x41b   : > { %v1212_v44 = vpop.f32.mrf.mxu0 }
 0x41c   : > { %1925 = vmatmul.mubr.msk.f32.vlgmr.msra.gmra.mxu0 %vm638_vm2, %v1212_v44 }
 0x41d   : > { %v1906_v45 = vpop.f32.mrf.mxu0 }
 0x41f   : > { %v1288_v46 = vpop.f32.mrf.mxu1 }
 0x420   : > { %1930 = vmatmul.mubr.msk.f32.vlgmr.msra.gmra.mxu1 %vm638_vm2, %v1288_v46 }
 0x421   : > { %v1911_v47 = vpop.f32.mrf.mxu1 }
 0x422   : > { %2009 = shalt.err (!%p2006_p3)
}
 0x423   : > { %s2010_s19 = scalar_lea.hbm %s1643_s9, 128  ;;  %s2014_s21 = scalar_lea.hbm %s2459_s7, 256 }
 0x424   : > { %p2011_p4 = scmp.ne.s32.totalorder %s1643_s9, %s2010_s19  ;;  %p2015_p9 = scmp.lt.s32.totalorder %s1643_s9, %s2459_s7 }
 0x425   : > { %p2016_p10 = scmp.lt.s32.totalorder %s2014_s21, %s2010_s19 }
 0x426   : > { %p2012_p7 = pnand %p2011_p4, %p2172_p5 }
 0x427   : > { %p2017_p11 = por %p2016_p10, %p2015_p9 }
 0x428   : > { %p2013_p8 = pneg %p2012_p7 }
 0x42a   : > { %p2018_p12 = pnand %p2017_p11, %p2013_p8 }
 0x42c   : > { %2021 = shalt.err (!%p2018_p12)
}
 0x42d   : > { %1933 = dma.vmem_to_hbm [thread:$0]  (%p2172_p5), %s1646_s13, 128, %s1643_s9, %s1619_s14   ;;  %v1777_v60 = vld [vmem:[%s2457_s5] ss:$0 sm:$0xff] }
 0x42e   : > { %s2464_s9 = sshll.u32 %s2348_s23, 3  ;;  %s2465_s15 = sshll.u32 %s2155_s28, 7 }
 0x42f   : > { %s284_s13 = scalar_lea.vmem [#allocation2], %s2464_s9  ;;  %s1630_s18 = scalar_lea.hbm %s2458_s6, %s2465_s15 }
 0x430   : > { %s1632_s14 = sshll.u32 %s284_s13, 4  ;;  %s1614_s19 = scalar_lea.sflag [#allocation3], %s2348_s23  ;;  %s1633_s14 = int_to_ptr.vmem [resolvable:$true] %s1632_s14 }
 0x431   : > { %s2022_s8 = scalar_lea.vmem %s1633_s14, 128  ;;  %s2093_s22 = smov [#allocation2]  }
 0x432   : > { %p2023_p13 = scmp.ne.s32.totalorder %s1633_s14, %s2022_s8  ;;  %s2026_s21 = sshll.u32 %s2093_s22, 4  ;;  %s2027_s21 = int_to_ptr.vmem [resolvable:$false] %s2026_s21 }
 0x433   : > { %s2028_s29 = scalar_lea.vmem %s2027_s21, 256  ;;  %p2029_p2 = scmp.lt.s32.totalorder %s1633_s14, %s2027_s21 }
 0x434   : > { %p2024_p0 = pnand %p2023_p13, %p2172_p5  ;;  %p2030_p3 = scmp.lt.s32.totalorder %s2028_s29, %s2022_s8 }
 0x436   : > { %p2025_p1 = pneg %p2024_p0  ;;  %p2031_p4 = por %p2030_p3, %p2029_p2 }
 0x438   : > { %p2032_p7 = pnand %p2031_p4, %p2025_p1 }
 0x4d3   : > { %v1365_v2 = vpop.f32.mrf.mxu0 }
 0x4d4   : > { %v1588_v53 = vsel %vm345_vm1, %v1365_v2, 0.0 }
 0x4d5   : > { %v1916_v48 = vpop.f32.mrf.mxu0 }
 0x4d7   : > { %v1438_v49 = vpop.f32.mrf.mxu1 }
 0x4d8   : > { %v1589_v51 = vsel %vm345_vm1, %v1438_v49, 0.0 }
 0x4d9   : > { %v1921_v50 = vpop.f32.mrf.mxu1  ;;  %v1590_v55 = vadd.f32 %v1589_v51, %v1588_v53 }
 0x4dc   : > { %v1511_v52 = vpop.f32.mrf.mxu0 }
 0x4dd   : > { %v1591_v54 = vsel %vm345_vm1, %v1511_v52, 0.0 }
 0x4de   : > { %v1926_v56 = vpop.f32.mrf.mxu0  ;;  %v1592_v57 = vadd.f32 %v1591_v54, %v1590_v55 }
 0x4e0   : > { %v1584_v58 = vpop.f32.mrf.mxu1 }
 0x4e1   : > { %v1593_v59 = vsel %vm345_vm1, %v1584_v58, 0.0 }
 0x4e2   : > { %v1594_v61 = vadd.f32 %v1593_v59, %v1592_v57  ;;  %v1931_v62 = vpop.f32.mrf.mxu1 }
 0x4e4   : > { %v1602_v63 = vadd.f32 %v1777_v60, %v1594_v61 }
 0x4e6   : > { %1603 = vst.msk [vmem:[%s284_s13] sm:$0xff] %vm345_vm1, %v1602_v63 }
 0x4e7   : > { %2035 = shalt.err (!%p2032_p7)
}
 0x4e8   : > { %s2036_s28 = scalar_lea.hbm %s1630_s18, 128  ;;  %s2040_s9 = scalar_lea.hbm %s2458_s6, 256 }
 0x4e9   : > { %p2037_p8 = scmp.ne.s32.totalorder %s1630_s18, %s2036_s28  ;;  %p2041_p11 = scmp.lt.s32.totalorder %s1630_s18, %s2458_s6 }
 0x4ea   : > { %p2042_p12 = scmp.lt.s32.totalorder %s2040_s9, %s2036_s28 }
 0x4eb   : > { %p2038_p9 = pnand %p2037_p8, %p2172_p5 }
 0x4ec   : > { %p2043_p13 = por %p2042_p12, %p2041_p11 }
 0x4ed   : > { %p2039_p10 = pneg %p2038_p9 }
 0x4ef   : > { %p2044_p0 = pnand %p2043_p13, %p2039_p10 }
 0x4f1   : > { %2047 = shalt.err (!%p2044_p0)
}
 0x4f2   : > { %1932 = dma.vmem_to_hbm [thread:$0]  (%p2172_p5), %s1633_s14, 128, %s1630_s18, %s1614_s19  }
 0x4f3 PF: > { %p1943_p1 = scmp.ge.s32.totalorder %s2086_s27, 2  ;;  %s1657_s16 = sand.u32 1, %s2074_s24  }
 0x4f4   : > { %s1658_s17 = scalar_lea.sflag [#allocation3], %s1657_s16 }
 0x4f5   : > { %p1937_p2 = pnand %p1943_p1, %p2176_p6 }
 0x4f7   : > { %p1938_p3 = pneg %p1937_p2 }
 0x4f9   : > { %2065 = dma.done.wait (%p1938_p3), %s1658_s17, 128  }
 0x4fa   : > { %2067 = vsyncadd (%p1938_p3), %s1658_s17, 4294967168  ;;  %s1667_s8 = scalar_lea.sflag [#allocation5], %s1657_s16 }
 0x4fb   : > { %2069 = dma.done.wait (%p1938_p3), %s1667_s8, 128  }
 0x4fc   : > { %2071 = vsyncadd (%p1938_p3), %s1667_s8, 4294967168  ;;  %p21_p5 = scmp.ge.s32.totalorder %s2159_s30, 4   ;;  %s2466_s24 = smov %s2078_s25 }
 0x4fd   : > { %s2467_s25 = smov %s2082_s26  ;;  %s2468_s26 = smov %s2170_s10 }
 0x4fe   : > { %s2469_s27 = smov %s2159_s30  ;;  %23 = sbr.rel (!%p21_p5) target bundleno = 5 (0x5), region = 99 }
 0x503   :  { %1672 = vsyncpa [#allocation3], 1 }
 0x504   :  { %1674 = vsyncpa [#allocation3 + $0x1], 1 }
 0x505   :  { %1675 = vsyncpa [#allocation5], 1 }
 0x506   :  { %1677 = vsyncpa [#allocation5 + $0x1], 1 }

</bundles_post_ra>
